<compile_context>
chip_gen: v6e
topology: v6e:2x2x1
jax: 0.10.0
libtpu: 0.0.40
codegen_flags: <defaults>
</compile_context>

<pallas_src>
import jax
import jax.numpy as jnp
from jax.experimental import pallas as pl
from jax.experimental.pallas import tpu as pltpu


def _critic_kernel(xt_ref, w1t_ref, b1_ref, w2t_ref, b2_ref, w3_ref, b3_ref,
                   q_ref):
    # All activations are batch-on-lanes: (features, TB).
    xt = xt_ref[...]                                               # (D_in, TB)
    # fc1: (H, D_in) @ (D_in, TB) -> (H, TB), f32 accumulation + f32 bias.
    h1 = jnp.dot(w1t_ref[...], xt,
                 preferred_element_type=jnp.float32) + b1_ref[...]
    h1 = jnp.maximum(h1, 0.0).astype(w2t_ref.dtype)
    # fc2: (H, H) @ (H, TB) -> (H, TB)
    h2 = jnp.dot(w2t_ref[...], h1,
                 preferred_element_type=jnp.float32) + b2_ref[...]
    h2 = jnp.maximum(h2, 0.0)                                      # (H, TB) f32
    # fc3: VPU multiply + sublane reduce over H (avoid an M=1 MXU matmul),
    # lane-dense (1, TB) result; b3 comes from SMEM as a scalar.
    q = jnp.sum(h2 * w3_ref[...], axis=0, keepdims=True) + b3_ref[0]
    q_ref[...] = q.astype(q_ref.dtype)


_LANE = 128


def _round_up(x, m):
    return ((x + m - 1) // m) * m


def _pick_tile(B, tile_cols):
    """Lane-dim tile size for the batch axis."""
    cap = max(_LANE, _round_up(int(tile_cols), _LANE))
    if B <= cap:
        # Split one exact tile into two lane-aligned halves when cleanly
        # possible (keeps both v7x TensorCores busy); otherwise one exact
        # tile equal to the full batch dim (no ragged block at all).
        if B % (2 * _LANE) == 0:
            return B // 2
        return B
    # Multi-tile path: lane-aligned tile, at least two tiles (v7x megacore);
    # a ragged last block is handled by Mosaic's masked boundary DMA.
    half = max(_LANE, _round_up(-(-B // 2), _LANE))
    return min(cap, half)


def facmac_discrete_critic_forward(inputs, actions, params, hidden_state=None,
                                   tile_cols=2048, use_bf16=True):
    """Mirrors FACMACDiscreteCritic.forward (critic_spectral == 'nnn' path).

    inputs : (..., obs_dim)    actions: (..., n_actions) or None
    Returns (q, hidden_state) with q of shape (B, 1) float32.
    """
    w1, b1, w2, b2, w3, b3 = (params[k] for k in ("w1", "b1", "w2", "b2", "w3", "b3"))
    D_in, H = w1.shape

    if actions is not None:
        n_act = actions.shape[-1]
        obs_dim = D_in - n_act
        x = jnp.concatenate(
            [inputs.reshape(-1, obs_dim), actions.reshape(-1, n_act)], axis=-1)
    else:
        x = inputs.reshape(-1, D_in)
    B = x.shape[0]

    mm_dtype = jnp.bfloat16 if use_bf16 else jnp.float32

    # Batch-on-lanes layout: activations are (features, batch), weights are
    # pre-transposed once here, so every in-kernel matmul has a lane-dense
    # N = TB and the q output is a lane-dense (1, TB) row.
    xt = x.T.astype(mm_dtype)                        # (D_in, B)
    w1t = w1.T.astype(mm_dtype)                      # (H, D_in)
    w2t = w2.T.astype(mm_dtype)                      # (H, H)
    b1c = b1.reshape(H, 1).astype(jnp.float32)       # (H, 1)
    b2c = b2.reshape(H, 1).astype(jnp.float32)       # (H, 1)
    w3c = w3.reshape(H, 1).astype(jnp.float32)       # (H, 1)
    b3s = b3.reshape(1).astype(jnp.float32)          # scalar -> SMEM

    TB = _pick_tile(B, tile_cols)
    num_tiles = pl.cdiv(B, TB)

    qt = pl.pallas_call(
        _critic_kernel,
        out_shape=jax.ShapeDtypeStruct((1, B), jnp.float32),
        grid=(num_tiles,),
        in_specs=[
            pl.BlockSpec((D_in, TB), lambda i: (0, i)),          # x^T tile (pipelined)
            pl.BlockSpec((H, D_in), lambda i: (0, 0)),           # w1^T (VMEM-resident)
            pl.BlockSpec((H, 1), lambda i: (0, 0)),              # b1
            pl.BlockSpec((H, H), lambda i: (0, 0)),              # w2^T
            pl.BlockSpec((H, 1), lambda i: (0, 0)),              # b2
            pl.BlockSpec((H, 1), lambda i: (0, 0)),              # w3 column
            pl.BlockSpec(memory_space=pltpu.MemorySpace.SMEM),   # b3 scalar
        ],
        out_specs=pl.BlockSpec((1, TB), lambda i: (0, i)),
        compiler_params=pltpu.CompilerParams(
            dimension_semantics=("parallel",),
        ),
    )(xt, w1t, b1c, w2t, b2c, w3c, b3s)

    q = qt.reshape(B, 1)
    return q, hidden_state


def init_params(key, obs_dim, n_actions, hidden_dim):
    """Deterministic parameter init (PyTorch-style uniform fan-in bounds)."""
    d_in = obs_dim + n_actions
    ks = jax.random.split(key, 6)

    def lin(kw, kb, fan_in, fan_out):
        bound = 1.0 / jnp.sqrt(fan_in)
        w = jax.random.uniform(kw, (fan_in, fan_out), jnp.float32, -bound, bound)
        b = jax.random.uniform(kb, (1, fan_out), jnp.float32, -bound, bound)
        return w, b

    w1, b1 = lin(ks[0], ks[1], d_in, hidden_dim)
    w2, b2 = lin(ks[2], ks[3], hidden_dim, hidden_dim)
    w3, b3 = lin(ks[4], ks[5], hidden_dim, 1)
    return {"w1": w1, "b1": b1, "w2": w2, "b2": b2, "w3": w3, "b3": b3}


if __name__ == "__main__":
    # Small, module-consistent shapes:
    #   scheme['obs']['vshape'] = 12, n_actions = 4  -> input_shape = 16
    #   args.rnn_hidden_dim = 32, args.n_agents = 2, batch = 4  -> B = 8 rows
    obs_dim = 12
    n_actions = 4
    hidden_dim = 32
    bs, n_agents = 4, 2

    key = jax.random.PRNGKey(0)
    k_inp, k_act, k_par = jax.random.split(key, 3)

    inputs = jax.random.normal(k_inp, (bs, n_agents, obs_dim), jnp.float32)
    act_idx = jax.random.randint(k_act, (bs, n_agents), 0, n_actions)
    actions = jax.nn.one_hot(act_idx, n_actions, dtype=jnp.float32)

    params = init_params(k_par, obs_dim, n_actions, hidden_dim)

    def reference(inp, act):
        if act is not None:
            x = jnp.concatenate([inp.reshape(-1, obs_dim),
                                 act.reshape(-1, n_actions)], axis=-1)
        else:
            x = inp.reshape(-1, obs_dim + n_actions)
        h1 = jnp.maximum(x @ params["w1"] + params["b1"], 0.0)
        h2 = jnp.maximum(h1 @ params["w2"] + params["b2"], 0.0)
        return h2 @ params["w3"] + params["b3"]

    q_ref = reference(inputs, actions)

    # 1) Default path (bf16 MXU operands, f32 accumulation) — loose tolerance.
    q_bf16, _ = facmac_discrete_critic_forward(inputs, actions, params,
                                               hidden_state=None)
    q_bf16 = jax.block_until_ready(q_bf16)
    assert q_bf16.shape == (bs * n_agents, 1)
    assert jnp.allclose(q_bf16, q_ref, atol=5e-2, rtol=5e-2)

    # 2) Pure-f32 path — bitwise-level agreement with the JAX reference.
    q_f32, _ = facmac_discrete_critic_forward(inputs, actions, params,
                                              use_bf16=False)
    q_f32 = jax.block_until_ready(q_f32)
    assert jnp.allclose(q_f32, q_ref, atol=1e-5, rtol=1e-5)

    # 3) Multi-tile grid with a ragged last block (B=200, TB=128 -> 2 tiles,
    #    last tile masked by Mosaic).
    bs3 = 100
    inputs3 = jax.random.normal(jax.random.PRNGKey(1),
                                (bs3, n_agents, obs_dim), jnp.float32)
    idx3 = jax.random.randint(jax.random.PRNGKey(2), (bs3, n_agents), 0, n_actions)
    actions3 = jax.nn.one_hot(idx3, n_actions, dtype=jnp.float32)
    q3, _ = facmac_discrete_critic_forward(inputs3, actions3, params,
                                           tile_cols=128, use_bf16=False)
    q3 = jax.block_until_ready(q3)
    q3_ref = reference(inputs3, actions3)
    assert q3.shape == (bs3 * n_agents, 1)
    assert jnp.allclose(q3, q3_ref, atol=1e-5, rtol=1e-5)

    # 4) actions=None path (inputs already contain the action slice).
    x4 = jnp.concatenate([inputs.reshape(-1, obs_dim),
                          actions.reshape(-1, n_actions)], axis=-1)
    q4, _ = facmac_discrete_critic_forward(x4, None, params, use_bf16=False)
    q4 = jax.block_until_ready(q4)
    assert jnp.allclose(q4, q_ref, atol=1e-5, rtol=1e-5)

    print("KERNEL_OK")
</pallas_src>

<mosaic_0001>
module attributes {stable_mosaic.version = 11 : i64} {
  func.func @_critic_kernel(%arg0: i32, %arg1: memref<16x8xbf16, #tpu.memory_space<vmem>>, %arg2: memref<32x16xbf16, #tpu.memory_space<vmem>>, %arg3: memref<32x1xf32, #tpu.memory_space<vmem>>, %arg4: memref<32x32xbf16, #tpu.memory_space<vmem>>, %arg5: memref<32x1xf32, #tpu.memory_space<vmem>>, %arg6: memref<32x1xf32, #tpu.memory_space<vmem>>, %arg7: memref<1xf32, #tpu.memory_space<smem>>, %arg8: memref<1x8xf32, #tpu.memory_space<vmem>>) attributes {dimension_semantics = [#tpu.dimension_semantics<parallel>], iteration_bounds = array<i64: 1>, scalar_prefetch = 0 : i64, scratch_operands = 0 : i64, tpu.core_type = #tpu.core_type<tc>, window_params = [{transform_indices = @transform_0, window_bounds = array<i64: 16, 8>}, {pipeline_mode = #tpu.pipeline_mode<synchronous>, transform_indices = @transform_1, window_bounds = array<i64: 32, 16>}, {pipeline_mode = #tpu.pipeline_mode<synchronous>, transform_indices = @transform_2, window_bounds = array<i64: 32, 1>}, {pipeline_mode = #tpu.pipeline_mode<synchronous>, transform_indices = @transform_3, window_bounds = array<i64: 32, 32>}, {pipeline_mode = #tpu.pipeline_mode<synchronous>, transform_indices = @transform_4, window_bounds = array<i64: 32, 1>}, {pipeline_mode = #tpu.pipeline_mode<synchronous>, transform_indices = @transform_5, window_bounds = array<i64: 32, 1>}, {transform_indices = @transform_6, window_bounds = array<i64: 1>}, {transform_indices = @transform_7, window_bounds = array<i64: 1, 8>}]} {
    %c0 = arith.constant 0 : index
    %c0_0 = arith.constant 0 : index
    %0 = vector.load %arg1[%c0, %c0_0] : memref<16x8xbf16, #tpu.memory_space<vmem>>, vector<16x8xbf16>
    %c0_1 = arith.constant 0 : index
    %c0_2 = arith.constant 0 : index
    %1 = vector.load %arg2[%c0_1, %c0_2] : memref<32x16xbf16, #tpu.memory_space<vmem>>, vector<32x16xbf16>
    %cst = arith.constant dense<0.000000e+00> : vector<32x8xf32>
    %2 = tpu.matmul %1, %0, %cst {dimension_numbers = #tpu.dot_dimension_numbers<[1], [0], [0], [1], [0, 0, 1, 1], [], []>} : vector<32x16xbf16>, vector<16x8xbf16>, vector<32x8xf32> -> vector<32x8xf32>
    %c0_3 = arith.constant 0 : index
    %c0_4 = arith.constant 0 : index
    %3 = vector.load %arg3[%c0_3, %c0_4] : memref<32x1xf32, #tpu.memory_space<vmem>>, vector<32x1xf32>
    %4 = vector.broadcast %3 : vector<32x1xf32> to vector<32x8xf32>
    %5 = arith.addf %2, %4 : vector<32x8xf32>
    %cst_5 = arith.constant 0.000000e+00 : f32
    %6 = vector.broadcast %cst_5 : f32 to vector<32x8xf32>
    %7 = arith.maximumf %5, %6 : vector<32x8xf32>
    %8 = arith.truncf %7 : vector<32x8xf32> to vector<32x8xbf16>
    %c0_6 = arith.constant 0 : index
    %c0_7 = arith.constant 0 : index
    %9 = vector.load %arg4[%c0_6, %c0_7] : memref<32x32xbf16, #tpu.memory_space<vmem>>, vector<32x32xbf16>
    %cst_8 = arith.constant dense<0.000000e+00> : vector<32x8xf32>
    %10 = tpu.matmul %9, %8, %cst_8 {dimension_numbers = #tpu.dot_dimension_numbers<[1], [0], [0], [1], [0, 0, 1, 1], [], []>} : vector<32x32xbf16>, vector<32x8xbf16>, vector<32x8xf32> -> vector<32x8xf32>
    %c0_9 = arith.constant 0 : index
    %c0_10 = arith.constant 0 : index
    %11 = vector.load %arg5[%c0_9, %c0_10] : memref<32x1xf32, #tpu.memory_space<vmem>>, vector<32x1xf32>
    %12 = vector.broadcast %11 : vector<32x1xf32> to vector<32x8xf32>
    %13 = arith.addf %10, %12 : vector<32x8xf32>
    %cst_11 = arith.constant 0.000000e+00 : f32
    %14 = vector.broadcast %cst_11 : f32 to vector<32x8xf32>
    %15 = arith.maximumf %13, %14 : vector<32x8xf32>
    %c0_12 = arith.constant 0 : index
    %c0_13 = arith.constant 0 : index
    %16 = vector.load %arg6[%c0_12, %c0_13] : memref<32x1xf32, #tpu.memory_space<vmem>>, vector<32x1xf32>
    %17 = vector.broadcast %16 : vector<32x1xf32> to vector<32x8xf32>
    %18 = arith.mulf %15, %17 : vector<32x8xf32>
    %cst_14 = arith.constant dense<0.000000e+00> : vector<8xf32>
    %19 = vector.multi_reduction <add>, %18, %cst_14 [0] : vector<32x8xf32> to vector<8xf32>
    %20 = vector.shape_cast %19 : vector<8xf32> to vector<1x8xf32>
    %c0_15 = arith.constant 0 : index
    %21 = memref.load %arg7[%c0_15] : memref<1xf32, #tpu.memory_space<smem>>
    %22 = vector.broadcast %21 : f32 to vector<1x8xf32>
    %23 = arith.addf %20, %22 : vector<1x8xf32>
    %c0_16 = arith.constant 0 : index
    %c0_17 = arith.constant 0 : index
    %24 = vector.load %arg8[%c0_16, %c0_17] : memref<1x8xf32, #tpu.memory_space<vmem>>, vector<1x8xf32>
    tpu.vector_store %arg8[%c0_16, %c0_17], %23 {strides = array<i32>} : memref<1x8xf32, #tpu.memory_space<vmem>>, vector<1x8xf32>,
    return
  }
  func.func @transform_0(%arg0: i32) -> (i32, i32) {
    %c0_i32 = arith.constant 0 : i32
    %c0_i32_0 = arith.constant 0 : i32
    return %c0_i32, %arg0 : i32, i32
  }
  func.func @transform_1(%arg0: i32) -> (i32, i32) {
    %c0_i32 = arith.constant 0 : i32
    %c0_i32_0 = arith.constant 0 : i32
    %c0_i32_1 = arith.constant 0 : i32
    return %c0_i32, %c0_i32_0 : i32, i32
  }
  func.func @transform_2(%arg0: i32) -> (i32, i32) {
    %c0_i32 = arith.constant 0 : i32
    %c0_i32_0 = arith.constant 0 : i32
    %c0_i32_1 = arith.constant 0 : i32
    return %c0_i32, %c0_i32_0 : i32, i32
  }
  func.func @transform_3(%arg0: i32) -> (i32, i32) {
    %c0_i32 = arith.constant 0 : i32
    %c0_i32_0 = arith.constant 0 : i32
    %c0_i32_1 = arith.constant 0 : i32
    return %c0_i32, %c0_i32_0 : i32, i32
  }
  func.func @transform_4(%arg0: i32) -> (i32, i32) {
    %c0_i32 = arith.constant 0 : i32
    %c0_i32_0 = arith.constant 0 : i32
    %c0_i32_1 = arith.constant 0 : i32
    return %c0_i32, %c0_i32_0 : i32, i32
  }
  func.func @transform_5(%arg0: i32) -> (i32, i32) {
    %c0_i32 = arith.constant 0 : i32
    %c0_i32_0 = arith.constant 0 : i32
    %c0_i32_1 = arith.constant 0 : i32
    return %c0_i32, %c0_i32_0 : i32, i32
  }
  func.func @transform_6(%arg0: i32) -> i32 {
    %c0_i32 = arith.constant 0 : i32
    %c0_i32_0 = arith.constant 0 : i32
    return %c0_i32 : i32
  }
  func.func @transform_7(%arg0: i32) -> (i32, i32) {
    %c0_i32 = arith.constant 0 : i32
    %c0_i32_0 = arith.constant 0 : i32
    return %c0_i32, %arg0 : i32, i32
  }
}

</mosaic_0001>

<bundles_post_ra>
// kernel: tpu_custom_call.1
= control target key start
LH: loop header
LB: loop body
LE: loop exit
PB: predicated region body
PF: predicated region fallthrough
CT: control target
= control target key end

     0   :  { %vm75_vm0 = vcmask 130048   ;;  %v357_v3 = vmov 0   ;;  %s458_s0 = inlined_call_operand.vmem [shape: bf16[16,8], index: 0, kind: input, shape index: {}]   ;;  %s459_s1 = inlined_call_operand.vmem [shape: bf16[32,16], index: 1, kind: input, shape index: {}]   ;;  %s460_s2 = inlined_call_operand.vmem [shape: f32[32,1], index: 2, kind: input, shape index: {}]   ;;  %s461_s3 = inlined_call_operand.vmem [shape: bf16[32,32], index: 3, kind: input, shape index: {}]   ;;  %s462_s4 = inlined_call_operand.vmem [shape: f32[32,1], index: 4, kind: input, shape index: {}]   ;;  %s463_s5 = inlined_call_operand.vmem [shape: f32[32,1], index: 5, kind: input, shape index: {}]   ;;  %s464_s6 = inlined_call_operand.<no memory space> [shape: f32[1], index: 6, kind: input, shape index: {}]   ;;  %s465_s7 = inlined_call_operand.hbm [shape: f32[1,8], index: 7, kind: output, shape index: {}]  }
   0x1   :  { %v330_v0 = vld [vmem:[%s458_s0] sm:$0xff]   ;;  %v332_v2 = vld [vmem:[%s459_s1 + $0x8] sm:$0xff]   ;;  %328 = vset.pattern.permute.xlu0 %v357_v3  ;;  %v37_v4 = vld [vmem:[%s460_s2 + $0x10] sm:$0xff]  ;;  %329 = vset.pattern.permute.xlu1 %v357_v3 }
   0x2   :  { %v331_v1 = vld [vmem:[%s459_s1] sm:$0xff]   ;;  %312 = vmatprep.subr.bf16.mxu0 %v330_v0  ;;  %51 = vperm.xlu0 %328, %v37_v4   ;;  %v38_v6 = vld [vmem:[%s460_s2 + $0x18] sm:$0xff]  ;;  %v36_v7 = vld [vmem:[%s460_s2 + $0x8] sm:$0xff] }
   0x3   :  { %313 = vmatpush3.bf16.msra.mxu0 %v330_v0  ;;  %314 = vmatprep.mubr.msk.bf16.mxu0 %vm75_vm0, %v331_v1  ;;  %v35_v5 = vld [vmem:[%s460_s2] sm:$0xff] }
   0x4   :  { %41 = vperm.xlu1 %329, %v35_v5  }
   0x6   :  { %315 = vmatmul.mubr.msk.bf16.vlgmr.msra.gmra.mxu0 %vm75_vm0, %v332_v2  ;;  %56 = vperm.xlu0 %328, %v38_v6  }
   0x7   :  { %13 = vsyncpa [#allocation4], 0  ;;  %v141_v8 = vld [vmem:[%s462_s4] sm:$0xff]  ;;  %v142_v9 = vld [vmem:[%s462_s4 + $0x8] sm:$0xff]  ;;  %vm175_vm1 = vcmask 261120   ;;  %vm263_vm2 = vcmask 64512  }
   0x8   :  { %46 = vperm.xlu1 %329, %v36_v7   ;;  %v143_v10 = vld [vmem:[%s462_s4 + $0x10] sm:$0xff]  ;;  %v144_v11 = vld [vmem:[%s462_s4 + $0x18] sm:$0xff]  ;;  %v235_v12 = vld [vmem:[%s463_s5] sm:$0xff]  ;;  %s358_s8 = smov [#allocation3]   ;;  %vm280_vm3 = vcmask 57344  }
   0x9   :  { %v236_v13 = vld [vmem:[%s463_s5 + $0x8] sm:$0xff]  ;;  %v237_v14 = vld [vmem:[%s463_s5 + $0x10] sm:$0xff]  ;;  %v238_v15 = vld [vmem:[%s463_s5 + $0x18] sm:$0xff]  ;;  %s288_s9 = sshll.u32 %s358_s8, 4  ;;  %s289_s9 = int_to_ptr.vmem [resolvable:$true] %s288_s9 }
   0xa   :  { %147 = vperm.xlu0 %328, %v141_v8   ;;  %v333_v16 = vld [vmem:[%s461_s3] sm:$0xff]   ;;  %v334_v35 = vld [vmem:[%s461_s3 + $0x8] sm:$0xff]   ;;  %v278_v8 = vstv %s464_s6  ;;  %s335_s0 = scalar_lea.vmem %s289_s9, 16  ;;  %s339_s10 = scalar_lea.vmem %s289_s9, 32 }
   0xb   :  { %322 = vmatprep.mubr.msk.bf16.mxu1 %vm175_vm1, %v333_v16  ;;  %p336_p0 = scmp.ne.s32.totalorder %s289_s9, %s335_s0  ;;  %p340_p1 = scmp.lt.s32.totalorder %s289_s9, %s289_s9 }
   0xc   :  { %152 = vperm.xlu1 %329, %v142_v9   ;;  %p341_p2 = scmp.lt.s32.totalorder %s339_s10, %s335_s0 }
   0xe   :  { %157 = vperm.xlu0 %328, %v143_v10   ;;  %p342_p3 = por %p341_p2, %p340_p1 }
  0x10   :  { %162 = vperm.xlu1 %329, %v144_v11   ;;  %p343_p4 = pnand %p342_p3, %p336_p0 }
  0x12   :  { %241 = vperm.xlu0 %328, %v235_v12  }
  0x14   :  { %246 = vperm.xlu1 %329, %v236_v13  }
  0x16   :  { %251 = vperm.xlu0 %328, %v237_v14  }
  0x18   :  { %256 = vperm.xlu1 %329, %v238_v15  }
  0x7d   :  { %v52_v17 = vpop.permute.xlu0 %51 }
  0x7f   :  { %v42_v18 = vpop.permute.xlu1 %41 }
  0x81   :  { %v57_v22 = vpop.permute.xlu0 %56 }
  0x83   :  { %v47_v26 = vpop.permute.xlu1 %46 }
  0x85   :  { %v148_v36 = vpop.permute.xlu0 %147 }
  0x87   :  { %v153_v37 = vpop.permute.xlu1 %152 }
  0x89   :  { %v158_v38 = vpop.permute.xlu0 %157 }
  0x8b   :  { %v163_v39 = vpop.permute.xlu1 %162 }
  0x8d   :  { %v242_v44 = vpop.permute.xlu0 %241 }
  0x8f   :  { %v247_v48 = vpop.permute.xlu1 %246 }
  0x91   :  { %v252_v55 = vpop.permute.xlu0 %251 }
  0x93   :  { %v257_v58 = vpop.permute.xlu1 %256 }
  0xc6   :  { %v316_v19 = vpop.f32.mrf.mxu0 }
  0xc7   :  { %v125_v21 = vadd.f32 %v316_v19, %v52_v17 }
  0xc8   :  { %v116_v20 = vpop.f32.mrf.mxu0 }
  0xc9   :  { %v117_v24 = vadd.f32 %v116_v20, %v42_v18  ;;  %v133_v28 = vmax.f32 %v125_v21, 0.0 }
  0xca   :  { %v317_v23 = vpop.f32.mrf.mxu0 }
  0xcb   :  { %v128_v25 = vadd.f32 %v317_v23, %v57_v22  ;;  %v131_v31 = vmax.f32 %v117_v24, 0.0 }
  0xcc   :  { %v119_v27 = vpop.f32.mrf.mxu0 }
  0xcd   :  { %v134_v29 = vmax.f32 %v128_v25, 0.0  ;;  %v120_v30 = vadd.f32 %v119_v27, %v47_v26 }
  0xcf   :  { %v132_v32 = vmax.f32 %v120_v30, 0.0  ;;  %v136_v33 = vpack.c.bf16 %v134_v29, %v133_v28 }
  0xd1   :  { %v135_v34 = vpack.c.bf16 %v132_v32, %v131_v31  ;;  %318 = vmatprep.subr.bf16.mxu1 %v136_v33 }
  0xd2   :  { %319 = vmatpush3.bf16.msra.mxu1 %v136_v33 }
  0xd3   :  { %320 = vmatprep.subr.bf16.mxu1 %v135_v34 }
  0xd6   :  { %321 = vmatpush3.bf16.msra.mxu1 %v135_v34 }
  0xd9   :  { %323 = vmatmul.mubr.msk.bf16.vlgmr.msra.gmra.mxu1 %vm175_vm1, %v334_v35 }
 0x199   :  { %v324_v40 = vpop.f32.mrf.mxu1 }
 0x19a   :  { %v225_v42 = vadd.f32 %v324_v40, %v158_v38 }
 0x19b   :  { %v216_v41 = vpop.f32.mrf.mxu1 }
 0x19c   :  { %v217_v43 = vadd.f32 %v216_v41, %v148_v36  ;;  %v233_v50 = vmax.f32 %v225_v42, 0.0 }
 0x19d   :  { %v325_v45 = vpop.f32.mrf.mxu1 }
 0x19e   :  { %v231_v46 = vmax.f32 %v217_v43, 0.0  ;;  %v228_v47 = vadd.f32 %v325_v45, %v163_v39  ;;  %v261_v56 = vmul.f32 %v252_v55, %v233_v50 }
 0x19f   :  { %v219_v49 = vpop.f32.mrf.mxu1 }
 0x1a0   :  { %v220_v51 = vadd.f32 %v219_v49, %v153_v37  ;;  %v259_v52 = vmul.f32 %v242_v44, %v231_v46  ;;  %v234_v53 = vmax.f32 %v228_v47, 0.0  ;;  %v267_v63 = vsel %vm263_vm2, %v261_v56, 0.0 }
 0x1a2   :  { %v232_v54 = vmax.f32 %v220_v51, 0.0  ;;  %v264_v59 = vsel %vm263_vm2, %v259_v52, 0.0  ;;  %v262_v60 = vmul.f32 %v257_v58, %v234_v53 }
 0x1a4   :  { %v260_v57 = vmul.f32 %v247_v48, %v232_v54  ;;  %v269_v1 = vsel %vm263_vm2, %v262_v60, 0.0 }
 0x1a6   :  { %v265_v61 = vsel %vm263_vm2, %v260_v57, 0.0 }
 0x1a7   :  { %v266_v62 = vadd.f32 %v265_v61, %v264_v59 }
 0x1a9   :  { %v268_v0 = vadd.f32 %v267_v63, %v266_v62 }
 0x1ab   :  { %v270_v2 = vadd.f32 %v269_v1, %v268_v0 }
 0x1ad   :  { %v271_v3 = vrot.slane %v270_v2, 4 }
 0x1af   :  { %v272_v4 = vadd.f32 %v271_v3, %v270_v2 }
 0x1b1   :  { %v273_v5 = vrot.slane %v272_v4, 2 }
 0x1b3   :  { %v274_v6 = vadd.f32 %v273_v5, %v272_v4 }
 0x1b5   :  { %v275_v7 = vrot.slane %v274_v6, 1 }
 0x1b7   :  { %v276_v9 = vadd.f32 %v275_v7, %v274_v6 }
 0x1b9   :  { %v279_v10 = vadd.f32 %v278_v8, %v276_v9 }
 0x1bb   :  { %281 = vst.msk [vmem:[#allocation3] sm:$0x1] %vm280_vm3, %v279_v10 }
 0x1bc   :  { %346 = shalt.err (!%p343_p4)
}
 0x1bd   :  { %291 = dma.vmem_to_hbm [thread:$0]  %s289_s9, 16, %s465_s7, [#allocation4]  }
 0x1be   :  { %355 = dma.done.wait [#allocation4], 16  }
 0x1bf   :  { %356 = vsyncadd [#allocation4], 4294967280 }
 0x1c0   :  { %295 = vsyncpa [#allocation4], 1 }

</bundles_post_ra>
